<compile_context>
chip_gen: v7x
topology: tpu7x:2x2x1
jax: 0.10.0
libtpu: 0.0.40
codegen_flags: <defaults>
</compile_context>

<pallas_src>
import jax
import jax.numpy as jnp
from jax.experimental import pallas as pl
from jax.experimental.pallas import tpu as pltpu

KERNEL_SIZE = 3
NEG_SLOPE = 0.1          # module default: LeakyReLU(negative_slope=0.1)


def _round_up(x, m):
    return (x + m - 1) // m * m


def _vmem_capacity_bytes():
    try:
        cap = int(pltpu.get_tpu_info().vmem_capacity_bytes)
        if cap > 0:
            return cap
    except Exception:
        pass
    return 64 * 1024 * 1024          # conservative fallback (v7x per-TensorCore)


def _choose_row_tile(N, H, Wp, Wout, Cp, K, in_it, out_it, budget_bytes):
    """Largest even row tile whose estimated per-step VMEM footprint fits the
    budget: double-buffered body/halo/output blocks, resident folded weights,
    the f32 accumulator and transient shifted-window copies.  Capped so the
    grid keeps >= 2 steps (v7x megacore) and preferring a divisor of H."""
    w_bytes = KERNEL_SIZE * KERNEL_SIZE * Cp * K * in_it

    def footprint(th):
        body = th * Wp * Cp * in_it
        halo = 2 * Wp * Cp * in_it
        outb = th * Wout * K * out_it
        acc = th * Wout * K * 4                     # f32 accumulator
        tap = th * Wout * Cp * in_it                # transient shifted window
        return 2 * (body + halo + outb + w_bytes) + 2 * acc + 2 * tap

    h_cap = max(4, H + (H & 1))
    best = 4
    th = 6
    while th <= h_cap and footprint(th) <= budget_bytes:
        best = th
        th += 2
    # Keep both TensorCores busy on v7x: at least 2 grid steps when possible.
    while best > 4 and N * ((H + best - 1) // best) < 2:
        best -= 2
    # Prefer a tile that divides H: no padded rows, no wrapper row-slice pass.
    for cand in range(best, max(4, best // 2) - 1, -2):
        if H % cand == 0:
            return cand
    return best


def _conv3x3_lrelu_kernel(xm_ref, xh_ref, w_ref, o_ref):
    # xm_ref: (1, TH, Wp, Cp)  body rows of the zero-padded NHWC image
    # xh_ref: (1, 2,  Wp, Cp)  2-row bottom halo of the SAME padded image
    # w_ref : (9*Cp, K)        folded 3x3 weights, tap-major rows (kh, kw, c)
    # o_ref : (1, TH, W, K)    output tile (exact K, no channel padding)
    TH = o_ref.shape[1]
    W = o_ref.shape[2]
    K = o_ref.shape[3]
    Cp = xm_ref.shape[3]
    Tm = TH - 2                      # "main" output rows: need only body rows
    f32 = jnp.float32

    def tap_w(t):                    # (Cp, K) weights of tap t = kh*3 + kw
        return w_ref[t * Cp:(t + 1) * Cp, :]

    # --- main output rows 0 .. TH-3: every tap window lies inside the body ---
    acc_m = None
    for kh in range(KERNEL_SIZE):
        for kw in range(KERNEL_SIZE):
            lhs = xm_ref[0, kh:kh + Tm, kw:kw + W, :].reshape(Tm * W, Cp)
            d = jnp.dot(lhs, tap_w(kh * KERNEL_SIZE + kw),
                        preferred_element_type=f32)
            acc_m = d if acc_m is None else acc_m + d

    # --- tail output rows TH-2, TH-1: last 2 body rows + 2 halo rows --------
    tail = jnp.concatenate([xm_ref[0, Tm:TH], xh_ref[0]], axis=0)  # (4, Wp, Cp)
    acc_t = None
    for kh in range(KERNEL_SIZE):
        for kw in range(KERNEL_SIZE):
            lhs = tail[kh:kh + 2, kw:kw + W, :].reshape(2 * W, Cp)
            d = jnp.dot(lhs, tap_w(kh * KERNEL_SIZE + kw),
                        preferred_element_type=f32)
            acc_t = d if acc_t is None else acc_t + d

    # LeakyReLU(0.1) == max(x, 0.1*x) for 0 < slope < 1 (single VALU op).
    acc_m = jnp.maximum(acc_m, NEG_SLOPE * acc_m)
    acc_t = jnp.maximum(acc_t, NEG_SLOPE * acc_t)
    o_ref[0, :Tm] = acc_m.reshape(Tm, W, K).astype(o_ref.dtype)
    o_ref[0, Tm:] = acc_t.reshape(2, W, K).astype(o_ref.dtype)


def conv2d_leaky_relu(x_nchw, weight_oihw, *, compute_dtype=jnp.bfloat16,
                      out_dtype=jnp.float32, nchw_output=True, row_tile=None):
    """Forward pass of the Conv2d module: 3x3 conv (stride 1, pad 1, no bias)
    followed by LeakyReLU(0.1).

    Args:
      x_nchw:        (N, C, H, W) input.
      weight_oihw:   (K, C, 3, 3) PyTorch OIHW weights.
      compute_dtype: dtype of pipelined activations / MXU inputs (bf16 default,
                     f32 for exact numerics).  Accumulation is always f32.
      out_dtype:     dtype of the returned tensor (f32 default; use bf16 when
                     chaining layers to halve output HBM traffic).
      nchw_output:   if False return NHWC (skips the final transpose pass).
      row_tile:      optional explicit spatial row tile (even, >= 4).
    Returns:
      (N, K, H, W) tensor (or (N, H, W, K) if nchw_output=False) in out_dtype.
    """
    N, C, H, W = x_nchw.shape
    K = weight_oihw.shape[0]
    assert weight_oihw.shape == (K, C, KERNEL_SIZE, KERNEL_SIZE)
    pad = KERNEL_SIZE // 2

    in_it = jnp.dtype(compute_dtype).itemsize
    out_it = jnp.dtype(out_dtype).itemsize
    sub = {4: 8, 2: 16, 1: 32}[in_it]
    Cp = _round_up(C, sub)                       # sublane-aligned input channels
    Wp = W + 2 * pad

    vmem_cap = _vmem_capacity_bytes()
    vmem_limit = (vmem_cap * 3) // 4             # ~96 MiB v5e/v6e, ~48 MiB v7x
    budget = (vmem_limit * 3) // 5

    if row_tile is None:
        TH = _choose_row_tile(N, H, Wp, W, Cp, K, in_it, out_it, budget)
    else:
        TH = max(4, row_tile + (row_tile & 1))   # even, >= 4
    n_tiles = pl.cdiv(H, TH)
    H_eff = n_tiles * TH

    # Layout plumbing (single fused XLA op): NCHW->NHWC, halo pad, bottom pad to
    # whole tiles, channel pad to Cp.  Zero padding keeps the math exact.
    x_nhwc = jnp.transpose(x_nchw, (0, 2, 3, 1)).astype(compute_dtype)
    x_pad = jnp.pad(
        x_nhwc, ((0, 0), (pad, pad + H_eff - H), (pad, pad), (0, Cp - C)))
    # x_pad: (N, H_eff + 2, Wp, Cp)

    # OIHW -> (KH, KW, C, K) -> channel pad -> fold taps onto the leading axis.
    w = jnp.transpose(weight_oihw, (2, 3, 1, 0)).astype(compute_dtype)
    w = jnp.pad(w, ((0, 0), (0, 0), (0, Cp - C), (0, 0)))
    w_folded = w.reshape(KERNEL_SIZE * KERNEL_SIZE * Cp, K)       # (9*Cp, K)

    flops = 2 * N * H * W * KERNEL_SIZE * KERNEL_SIZE * C * K
    bytes_accessed = int(x_pad.size * x_pad.dtype.itemsize * (TH + 2) / TH
                         + w_folded.size * w_folded.dtype.itemsize
                         + N * H_eff * W * K * out_it)

    out_nhwc = pl.pallas_call(
        _conv3x3_lrelu_kernel,
        out_shape=jax.ShapeDtypeStruct((N, H_eff, W, K), out_dtype),
        grid_spec=pltpu.PrefetchScalarGridSpec(
            num_scalar_prefetch=0,
            grid=(N, n_tiles),
            in_specs=[
                # Body rows [i*TH, (i+1)*TH) of the padded image.
                pl.BlockSpec((1, TH, Wp, Cp), lambda n, i: (n, i, 0, 0)),
                # 2-row bottom halo [(i+1)*TH, (i+1)*TH + 2) of the SAME image.
                pl.BlockSpec((1, 2, Wp, Cp),
                             lambda n, i: (n, (i + 1) * (TH // 2), 0, 0)),
                # Folded weights: resident across the whole grid.
                pl.BlockSpec((KERNEL_SIZE * KERNEL_SIZE * Cp, K),
                             lambda n, i: (0, 0)),
            ],
            out_specs=pl.BlockSpec((1, TH, W, K), lambda n, i: (n, i, 0, 0)),
        ),
        compiler_params=pltpu.CompilerParams(
            dimension_semantics=("parallel", "parallel"),
            vmem_limit_bytes=int(vmem_limit)),
        cost_estimate=pl.CostEstimate(
            flops=int(flops), transcendentals=0, bytes_accessed=bytes_accessed),
    )(x_pad, x_pad, w_folded)

    out = out_nhwc if H_eff == H else out_nhwc[:, :H]
    if nchw_output:
        out = jnp.transpose(out, (0, 3, 1, 2))   # N, K, H, W
    return out


if __name__ == "__main__":
    key = jax.random.PRNGKey(0)
    kx, kw_key = jax.random.split(key)

    N, C, H, W = 2, 4, 16, 16
    K = 8  # out_channels

    x = jax.random.normal(kx, (N, C, H, W), dtype=jnp.float32)
    fan_in = C * KERNEL_SIZE * KERNEL_SIZE
    bound = (6.0 / fan_in) ** 0.5
    weight = jax.random.uniform(kw_key, (K, C, KERNEL_SIZE, KERNEL_SIZE),
                                dtype=jnp.float32, minval=-bound, maxval=bound)

    def ref_conv(xi, wi):
        y = jax.lax.conv_general_dilated(
            xi, wi, window_strides=(1, 1), padding=((1, 1), (1, 1)),
            dimension_numbers=('NCHW', 'OIHW', 'NCHW'))
        return jnp.maximum(y, NEG_SLOPE * y)

    ref = ref_conv(x, weight)

    # Exact f32 path; row_tile=8 forces two spatial tiles per image so the
    # halo blocks and main/tail split are exercised.
    y32 = jax.block_until_ready(
        conv2d_leaky_relu(x, weight, compute_dtype=jnp.float32, row_tile=8))
    assert y32.shape == (N, K, H, W)
    assert jnp.allclose(y32, ref, atol=1e-4, rtol=1e-4)

    # Default path: bf16 MXU inputs, f32 accumulation/output, auto row tile.
    ybf = jax.block_until_ready(conv2d_leaky_relu(x, weight))
    assert ybf.shape == (N, K, H, W)
    assert jnp.allclose(ybf, ref, atol=5e-2, rtol=5e-2)

    # Ragged shapes: row tile not dividing H, C/K not lane/sublane aligned.
    N2, C2, H2, W2, K2 = 1, 3, 10, 12, 5
    x2 = jax.random.normal(jax.random.PRNGKey(1), (N2, C2, H2, W2),
                           dtype=jnp.float32)
    w2 = jax.random.uniform(jax.random.PRNGKey(2),
                            (K2, C2, KERNEL_SIZE, KERNEL_SIZE),
                            dtype=jnp.float32, minval=-0.5, maxval=0.5)
    y2 = jax.block_until_ready(
        conv2d_leaky_relu(x2, w2, compute_dtype=jnp.float32, row_tile=4))
    assert y2.shape == (N2, K2, H2, W2)
    assert jnp.allclose(y2, ref_conv(x2, w2), atol=1e-4, rtol=1e-4)

    print("KERNEL_OK")
</pallas_src>

<mosaic_0001>
module attributes {stable_mosaic.version = 11 : i64} {
  func.func @_conv3x3_lrelu_kernel(%arg0: i32, %arg1: i32, %arg2: memref<1x8x18x8xf32, #tpu.memory_space<vmem>>, %arg3: memref<1x2x18x8xf32, #tpu.memory_space<vmem>>, %arg4: memref<72x8xf32, #tpu.memory_space<vmem>>, %arg5: memref<1x8x16x8xf32, #tpu.memory_space<vmem>>) attributes {dimension_semantics = [#tpu.dimension_semantics<parallel>, #tpu.dimension_semantics<parallel>], iteration_bounds = array<i64: 2, 2>, scalar_prefetch = 0 : i64, scratch_operands = 0 : i64, tpu.core_type = #tpu.core_type<tc>, window_params = [{transform_indices = @transform_0, window_bounds = array<i64: 1, 8, 18, 8>}, {transform_indices = @transform_1, window_bounds = array<i64: 1, 2, 18, 8>}, {pipeline_mode = #tpu.pipeline_mode<synchronous>, transform_indices = @transform_2, window_bounds = array<i64: 72, 8>}, {transform_indices = @transform_3, window_bounds = array<i64: 1, 8, 16, 8>}]} {
    %c0 = arith.constant 0 : index
    %c0_0 = arith.constant 0 : index
    %c0_1 = arith.constant 0 : index
    %c0_2 = arith.constant 0 : index
    %0 = vector.load %arg2[%c0, %c0_0, %c0_1, %c0_2] : memref<1x8x18x8xf32, #tpu.memory_space<vmem>>, vector<1x6x16x8xf32>
    %1 = vector.shape_cast %0 : vector<1x6x16x8xf32> to vector<6x16x8xf32>
    %2 = vector.shape_cast %1 : vector<6x16x8xf32> to vector<96x8xf32>
    %c0_3 = arith.constant 0 : index
    %c0_4 = arith.constant 0 : index
    %3 = vector.load %arg4[%c0_3, %c0_4] : memref<72x8xf32, #tpu.memory_space<vmem>>, vector<8x8xf32>
    %cst = arith.constant dense<0.000000e+00> : vector<96x8xf32>
    %4 = tpu.matmul %2, %3, %cst {dimension_numbers = #tpu.dot_dimension_numbers<[1], [0], [0], [1], [0, 0, 1, 1], [], []>} : vector<96x8xf32>, vector<8x8xf32>, vector<96x8xf32> -> vector<96x8xf32>
    %c0_5 = arith.constant 0 : index
    %c0_6 = arith.constant 0 : index
    %c1 = arith.constant 1 : index
    %c0_7 = arith.constant 0 : index
    %5 = vector.load %arg2[%c0_5, %c0_6, %c1, %c0_7] : memref<1x8x18x8xf32, #tpu.memory_space<vmem>>, vector<1x6x16x8xf32>
    %6 = vector.shape_cast %5 : vector<1x6x16x8xf32> to vector<6x16x8xf32>
    %7 = vector.shape_cast %6 : vector<6x16x8xf32> to vector<96x8xf32>
    %c8 = arith.constant 8 : index
    %c0_8 = arith.constant 0 : index
    %8 = vector.load %arg4[%c8, %c0_8] : memref<72x8xf32, #tpu.memory_space<vmem>>, vector<8x8xf32>
    %cst_9 = arith.constant dense<0.000000e+00> : vector<96x8xf32>
    %9 = tpu.matmul %7, %8, %cst_9 {dimension_numbers = #tpu.dot_dimension_numbers<[1], [0], [0], [1], [0, 0, 1, 1], [], []>} : vector<96x8xf32>, vector<8x8xf32>, vector<96x8xf32> -> vector<96x8xf32>
    %10 = arith.addf %4, %9 : vector<96x8xf32>
    %c0_10 = arith.constant 0 : index
    %c0_11 = arith.constant 0 : index
    %c2 = arith.constant 2 : index
    %c0_12 = arith.constant 0 : index
    %11 = vector.load %arg2[%c0_10, %c0_11, %c2, %c0_12] : memref<1x8x18x8xf32, #tpu.memory_space<vmem>>, vector<1x6x16x8xf32>
    %12 = vector.shape_cast %11 : vector<1x6x16x8xf32> to vector<6x16x8xf32>
    %13 = vector.shape_cast %12 : vector<6x16x8xf32> to vector<96x8xf32>
    %c16 = arith.constant 16 : index
    %c0_13 = arith.constant 0 : index
    %14 = vector.load %arg4[%c16, %c0_13] : memref<72x8xf32, #tpu.memory_space<vmem>>, vector<8x8xf32>
    %cst_14 = arith.constant dense<0.000000e+00> : vector<96x8xf32>
    %15 = tpu.matmul %13, %14, %cst_14 {dimension_numbers = #tpu.dot_dimension_numbers<[1], [0], [0], [1], [0, 0, 1, 1], [], []>} : vector<96x8xf32>, vector<8x8xf32>, vector<96x8xf32> -> vector<96x8xf32>
    %16 = arith.addf %10, %15 : vector<96x8xf32>
    %c0_15 = arith.constant 0 : index
    %c1_16 = arith.constant 1 : index
    %c0_17 = arith.constant 0 : index
    %c0_18 = arith.constant 0 : index
    %17 = vector.load %arg2[%c0_15, %c1_16, %c0_17, %c0_18] : memref<1x8x18x8xf32, #tpu.memory_space<vmem>>, vector<1x6x16x8xf32>
    %18 = vector.shape_cast %17 : vector<1x6x16x8xf32> to vector<6x16x8xf32>
    %19 = vector.shape_cast %18 : vector<6x16x8xf32> to vector<96x8xf32>
    %c24 = arith.constant 24 : index
    %c0_19 = arith.constant 0 : index
    %20 = vector.load %arg4[%c24, %c0_19] : memref<72x8xf32, #tpu.memory_space<vmem>>, vector<8x8xf32>
    %cst_20 = arith.constant dense<0.000000e+00> : vector<96x8xf32>
    %21 = tpu.matmul %19, %20, %cst_20 {dimension_numbers = #tpu.dot_dimension_numbers<[1], [0], [0], [1], [0, 0, 1, 1], [], []>} : vector<96x8xf32>, vector<8x8xf32>, vector<96x8xf32> -> vector<96x8xf32>
    %22 = arith.addf %16, %21 : vector<96x8xf32>
    %c0_21 = arith.constant 0 : index
    %c1_22 = arith.constant 1 : index
    %c1_23 = arith.constant 1 : index
    %c0_24 = arith.constant 0 : index
    %23 = vector.load %arg2[%c0_21, %c1_22, %c1_23, %c0_24] : memref<1x8x18x8xf32, #tpu.memory_space<vmem>>, vector<1x6x16x8xf32>
    %24 = vector.shape_cast %23 : vector<1x6x16x8xf32> to vector<6x16x8xf32>
    %25 = vector.shape_cast %24 : vector<6x16x8xf32> to vector<96x8xf32>
    %c32 = arith.constant 32 : index
    %c0_25 = arith.constant 0 : index
    %26 = vector.load %arg4[%c32, %c0_25] : memref<72x8xf32, #tpu.memory_space<vmem>>, vector<8x8xf32>
    %cst_26 = arith.constant dense<0.000000e+00> : vector<96x8xf32>
    %27 = tpu.matmul %25, %26, %cst_26 {dimension_numbers = #tpu.dot_dimension_numbers<[1], [0], [0], [1], [0, 0, 1, 1], [], []>} : vector<96x8xf32>, vector<8x8xf32>, vector<96x8xf32> -> vector<96x8xf32>
    %28 = arith.addf %22, %27 : vector<96x8xf32>
    %c0_27 = arith.constant 0 : index
    %c1_28 = arith.constant 1 : index
    %c2_29 = arith.constant 2 : index
    %c0_30 = arith.constant 0 : index
    %29 = vector.load %arg2[%c0_27, %c1_28, %c2_29, %c0_30] : memref<1x8x18x8xf32, #tpu.memory_space<vmem>>, vector<1x6x16x8xf32>
    %30 = vector.shape_cast %29 : vector<1x6x16x8xf32> to vector<6x16x8xf32>
    %31 = vector.shape_cast %30 : vector<6x16x8xf32> to vector<96x8xf32>
    %c40 = arith.constant 40 : index
    %c0_31 = arith.constant 0 : index
    %32 = vector.load %arg4[%c40, %c0_31] : memref<72x8xf32, #tpu.memory_space<vmem>>, vector<8x8xf32>
    %cst_32 = arith.constant dense<0.000000e+00> : vector<96x8xf32>
    %33 = tpu.matmul %31, %32, %cst_32 {dimension_numbers = #tpu.dot_dimension_numbers<[1], [0], [0], [1], [0, 0, 1, 1], [], []>} : vector<96x8xf32>, vector<8x8xf32>, vector<96x8xf32> -> vector<96x8xf32>
    %34 = arith.addf %28, %33 : vector<96x8xf32>
    %c0_33 = arith.constant 0 : index
    %c2_34 = arith.constant 2 : index
    %c0_35 = arith.constant 0 : index
    %c0_36 = arith.constant 0 : index
    %35 = vector.load %arg2[%c0_33, %c2_34, %c0_35, %c0_36] : memref<1x8x18x8xf32, #tpu.memory_space<vmem>>, vector<1x6x16x8xf32>
    %36 = vector.shape_cast %35 : vector<1x6x16x8xf32> to vector<6x16x8xf32>
    %37 = vector.shape_cast %36 : vector<6x16x8xf32> to vector<96x8xf32>
    %c48 = arith.constant 48 : index
    %c0_37 = arith.constant 0 : index
    %38 = vector.load %arg4[%c48, %c0_37] : memref<72x8xf32, #tpu.memory_space<vmem>>, vector<8x8xf32>
    %cst_38 = arith.constant dense<0.000000e+00> : vector<96x8xf32>
    %39 = tpu.matmul %37, %38, %cst_38 {dimension_numbers = #tpu.dot_dimension_numbers<[1], [0], [0], [1], [0, 0, 1, 1], [], []>} : vector<96x8xf32>, vector<8x8xf32>, vector<96x8xf32> -> vector<96x8xf32>
    %40 = arith.addf %34, %39 : vector<96x8xf32>
    %c0_39 = arith.constant 0 : index
    %c2_40 = arith.constant 2 : index
    %c1_41 = arith.constant 1 : index
    %c0_42 = arith.constant 0 : index
    %41 = vector.load %arg2[%c0_39, %c2_40, %c1_41, %c0_42] : memref<1x8x18x8xf32, #tpu.memory_space<vmem>>, vector<1x6x16x8xf32>
    %42 = vector.shape_cast %41 : vector<1x6x16x8xf32> to vector<6x16x8xf32>
    %43 = vector.shape_cast %42 : vector<6x16x8xf32> to vector<96x8xf32>
    %c56 = arith.constant 56 : index
    %c0_43 = arith.constant 0 : index
    %44 = vector.load %arg4[%c56, %c0_43] : memref<72x8xf32, #tpu.memory_space<vmem>>, vector<8x8xf32>
    %cst_44 = arith.constant dense<0.000000e+00> : vector<96x8xf32>
    %45 = tpu.matmul %43, %44, %cst_44 {dimension_numbers = #tpu.dot_dimension_numbers<[1], [0], [0], [1], [0, 0, 1, 1], [], []>} : vector<96x8xf32>, vector<8x8xf32>, vector<96x8xf32> -> vector<96x8xf32>
    %46 = arith.addf %40, %45 : vector<96x8xf32>
    %c0_45 = arith.constant 0 : index
    %c2_46 = arith.constant 2 : index
    %c2_47 = arith.constant 2 : index
    %c0_48 = arith.constant 0 : index
    %47 = vector.load %arg2[%c0_45, %c2_46, %c2_47, %c0_48] : memref<1x8x18x8xf32, #tpu.memory_space<vmem>>, vector<1x6x16x8xf32>
    %48 = vector.shape_cast %47 : vector<1x6x16x8xf32> to vector<6x16x8xf32>
    %49 = vector.shape_cast %48 : vector<6x16x8xf32> to vector<96x8xf32>
    %c64 = arith.constant 64 : index
    %c0_49 = arith.constant 0 : index
    %50 = vector.load %arg4[%c64, %c0_49] : memref<72x8xf32, #tpu.memory_space<vmem>>, vector<8x8xf32>
    %cst_50 = arith.constant dense<0.000000e+00> : vector<96x8xf32>
    %51 = tpu.matmul %49, %50, %cst_50 {dimension_numbers = #tpu.dot_dimension_numbers<[1], [0], [0], [1], [0, 0, 1, 1], [], []>} : vector<96x8xf32>, vector<8x8xf32>, vector<96x8xf32> -> vector<96x8xf32>
    %52 = arith.addf %46, %51 : vector<96x8xf32>
    %c0_51 = arith.constant 0 : index
    %c6 = arith.constant 6 : index
    %c0_52 = arith.constant 0 : index
    %c0_53 = arith.constant 0 : index
    %53 = vector.load %arg2[%c0_51, %c6, %c0_52, %c0_53] : memref<1x8x18x8xf32, #tpu.memory_space<vmem>>, vector<1x2x18x8xf32>
    %54 = vector.shape_cast %53 : vector<1x2x18x8xf32> to vector<2x18x8xf32>
    %c0_54 = arith.constant 0 : index
    %c0_55 = arith.constant 0 : index
    %c0_56 = arith.constant 0 : index
    %c0_57 = arith.constant 0 : index
    %55 = vector.load %arg3[%c0_54, %c0_55, %c0_56, %c0_57] : memref<1x2x18x8xf32, #tpu.memory_space<vmem>>, vector<1x2x18x8xf32>
    %56 = vector.shape_cast %55 : vector<1x2x18x8xf32> to vector<2x18x8xf32>
    %57 = tpu.concatenate %54, %56 in 0 : vector<2x18x8xf32>, vector<2x18x8xf32> -> vector<4x18x8xf32>
    %58 = vector.extract_strided_slice %57 {offsets = [0, 0, 0], sizes = [2, 16, 8], strides = [1, 1, 1]} : vector<4x18x8xf32> to vector<2x16x8xf32>
    %59 = vector.shape_cast %58 : vector<2x16x8xf32> to vector<32x8xf32>
    %c0_58 = arith.constant 0 : index
    %c0_59 = arith.constant 0 : index
    %60 = vector.load %arg4[%c0_58, %c0_59] : memref<72x8xf32, #tpu.memory_space<vmem>>, vector<8x8xf32>
    %cst_60 = arith.constant dense<0.000000e+00> : vector<32x8xf32>
    %61 = tpu.matmul %59, %60, %cst_60 {dimension_numbers = #tpu.dot_dimension_numbers<[1], [0], [0], [1], [0, 0, 1, 1], [], []>} : vector<32x8xf32>, vector<8x8xf32>, vector<32x8xf32> -> vector<32x8xf32>
    %62 = vector.extract_strided_slice %57 {offsets = [0, 1, 0], sizes = [2, 16, 8], strides = [1, 1, 1]} : vector<4x18x8xf32> to vector<2x16x8xf32>
    %63 = vector.shape_cast %62 : vector<2x16x8xf32> to vector<32x8xf32>
    %c8_61 = arith.constant 8 : index
    %c0_62 = arith.constant 0 : index
    %64 = vector.load %arg4[%c8_61, %c0_62] : memref<72x8xf32, #tpu.memory_space<vmem>>, vector<8x8xf32>
    %cst_63 = arith.constant dense<0.000000e+00> : vector<32x8xf32>
    %65 = tpu.matmul %63, %64, %cst_63 {dimension_numbers = #tpu.dot_dimension_numbers<[1], [0], [0], [1], [0, 0, 1, 1], [], []>} : vector<32x8xf32>, vector<8x8xf32>, vector<32x8xf32> -> vector<32x8xf32>
    %66 = arith.addf %61, %65 : vector<32x8xf32>
    %67 = vector.extract_strided_slice %57 {offsets = [0, 2, 0], sizes = [2, 16, 8], strides = [1, 1, 1]} : vector<4x18x8xf32> to vector<2x16x8xf32>
    %68 = vector.shape_cast %67 : vector<2x16x8xf32> to vector<32x8xf32>
    %c16_64 = arith.constant 16 : index
    %c0_65 = arith.constant 0 : index
    %69 = vector.load %arg4[%c16_64, %c0_65] : memref<72x8xf32, #tpu.memory_space<vmem>>, vector<8x8xf32>
    %cst_66 = arith.constant dense<0.000000e+00> : vector<32x8xf32>
    %70 = tpu.matmul %68, %69, %cst_66 {dimension_numbers = #tpu.dot_dimension_numbers<[1], [0], [0], [1], [0, 0, 1, 1], [], []>} : vector<32x8xf32>, vector<8x8xf32>, vector<32x8xf32> -> vector<32x8xf32>
    %71 = arith.addf %66, %70 : vector<32x8xf32>
    %72 = vector.extract_strided_slice %57 {offsets = [1, 0, 0], sizes = [2, 16, 8], strides = [1, 1, 1]} : vector<4x18x8xf32> to vector<2x16x8xf32>
    %73 = vector.shape_cast %72 : vector<2x16x8xf32> to vector<32x8xf32>
    %c24_67 = arith.constant 24 : index
    %c0_68 = arith.constant 0 : index
    %74 = vector.load %arg4[%c24_67, %c0_68] : memref<72x8xf32, #tpu.memory_space<vmem>>, vector<8x8xf32>
    %cst_69 = arith.constant dense<0.000000e+00> : vector<32x8xf32>
    %75 = tpu.matmul %73, %74, %cst_69 {dimension_numbers = #tpu.dot_dimension_numbers<[1], [0], [0], [1], [0, 0, 1, 1], [], []>} : vector<32x8xf32>, vector<8x8xf32>, vector<32x8xf32> -> vector<32x8xf32>
    %76 = arith.addf %71, %75 : vector<32x8xf32>
    %77 = vector.extract_strided_slice %57 {offsets = [1, 1, 0], sizes = [2, 16, 8], strides = [1, 1, 1]} : vector<4x18x8xf32> to vector<2x16x8xf32>
    %78 = vector.shape_cast %77 : vector<2x16x8xf32> to vector<32x8xf32>
    %c32_70 = arith.constant 32 : index
    %c0_71 = arith.constant 0 : index
    %79 = vector.load %arg4[%c32_70, %c0_71] : memref<72x8xf32, #tpu.memory_space<vmem>>, vector<8x8xf32>
    %cst_72 = arith.constant dense<0.000000e+00> : vector<32x8xf32>
    %80 = tpu.matmul %78, %79, %cst_72 {dimension_numbers = #tpu.dot_dimension_numbers<[1], [0], [0], [1], [0, 0, 1, 1], [], []>} : vector<32x8xf32>, vector<8x8xf32>, vector<32x8xf32> -> vector<32x8xf32>
    %81 = arith.addf %76, %80 : vector<32x8xf32>
    %82 = vector.extract_strided_slice %57 {offsets = [1, 2, 0], sizes = [2, 16, 8], strides = [1, 1, 1]} : vector<4x18x8xf32> to vector<2x16x8xf32>
    %83 = vector.shape_cast %82 : vector<2x16x8xf32> to vector<32x8xf32>
    %c40_73 = arith.constant 40 : index
    %c0_74 = arith.constant 0 : index
    %84 = vector.load %arg4[%c40_73, %c0_74] : memref<72x8xf32, #tpu.memory_space<vmem>>, vector<8x8xf32>
    %cst_75 = arith.constant dense<0.000000e+00> : vector<32x8xf32>
    %85 = tpu.matmul %83, %84, %cst_75 {dimension_numbers = #tpu.dot_dimension_numbers<[1], [0], [0], [1], [0, 0, 1, 1], [], []>} : vector<32x8xf32>, vector<8x8xf32>, vector<32x8xf32> -> vector<32x8xf32>
    %86 = arith.addf %81, %85 : vector<32x8xf32>
    %87 = vector.extract_strided_slice %57 {offsets = [2, 0, 0], sizes = [2, 16, 8], strides = [1, 1, 1]} : vector<4x18x8xf32> to vector<2x16x8xf32>
    %88 = vector.shape_cast %87 : vector<2x16x8xf32> to vector<32x8xf32>
    %c48_76 = arith.constant 48 : index
    %c0_77 = arith.constant 0 : index
    %89 = vector.load %arg4[%c48_76, %c0_77] : memref<72x8xf32, #tpu.memory_space<vmem>>, vector<8x8xf32>
    %cst_78 = arith.constant dense<0.000000e+00> : vector<32x8xf32>
    %90 = tpu.matmul %88, %89, %cst_78 {dimension_numbers = #tpu.dot_dimension_numbers<[1], [0], [0], [1], [0, 0, 1, 1], [], []>} : vector<32x8xf32>, vector<8x8xf32>, vector<32x8xf32> -> vector<32x8xf32>
    %91 = arith.addf %86, %90 : vector<32x8xf32>
    %92 = vector.extract_strided_slice %57 {offsets = [2, 1, 0], sizes = [2, 16, 8], strides = [1, 1, 1]} : vector<4x18x8xf32> to vector<2x16x8xf32>
    %93 = vector.shape_cast %92 : vector<2x16x8xf32> to vector<32x8xf32>
    %c56_79 = arith.constant 56 : index
    %c0_80 = arith.constant 0 : index
    %94 = vector.load %arg4[%c56_79, %c0_80] : memref<72x8xf32, #tpu.memory_space<vmem>>, vector<8x8xf32>
    %cst_81 = arith.constant dense<0.000000e+00> : vector<32x8xf32>
    %95 = tpu.matmul %93, %94, %cst_81 {dimension_numbers = #tpu.dot_dimension_numbers<[1], [0], [0], [1], [0, 0, 1, 1], [], []>} : vector<32x8xf32>, vector<8x8xf32>, vector<32x8xf32> -> vector<32x8xf32>
    %96 = arith.addf %91, %95 : vector<32x8xf32>
    %97 = vector.extract_strided_slice %57 {offsets = [2, 2, 0], sizes = [2, 16, 8], strides = [1, 1, 1]} : vector<4x18x8xf32> to vector<2x16x8xf32>
    %98 = vector.shape_cast %97 : vector<2x16x8xf32> to vector<32x8xf32>
    %c64_82 = arith.constant 64 : index
    %c0_83 = arith.constant 0 : index
    %99 = vector.load %arg4[%c64_82, %c0_83] : memref<72x8xf32, #tpu.memory_space<vmem>>, vector<8x8xf32>
    %cst_84 = arith.constant dense<0.000000e+00> : vector<32x8xf32>
    %100 = tpu.matmul %98, %99, %cst_84 {dimension_numbers = #tpu.dot_dimension_numbers<[1], [0], [0], [1], [0, 0, 1, 1], [], []>} : vector<32x8xf32>, vector<8x8xf32>, vector<32x8xf32> -> vector<32x8xf32>
    %101 = arith.addf %96, %100 : vector<32x8xf32>
    %cst_85 = arith.constant 1.000000e-01 : f32
    %102 = vector.broadcast %cst_85 : f32 to vector<96x8xf32>
    %103 = arith.mulf %102, %52 : vector<96x8xf32>
    %104 = arith.maximumf %52, %103 : vector<96x8xf32>
    %cst_86 = arith.constant 1.000000e-01 : f32
    %105 = vector.broadcast %cst_86 : f32 to vector<32x8xf32>
    %106 = arith.mulf %105, %101 : vector<32x8xf32>
    %107 = arith.maximumf %101, %106 : vector<32x8xf32>
    %108 = vector.shape_cast %104 : vector<96x8xf32> to vector<6x16x8xf32>
    %c0_87 = arith.constant 0 : index
    %c0_88 = arith.constant 0 : index
    %c0_89 = arith.constant 0 : index
    %c0_90 = arith.constant 0 : index
    %109 = vector.load %arg5[%c0_87, %c0_88, %c0_89, %c0_90] : memref<1x8x16x8xf32, #tpu.memory_space<vmem>>, vector<1x6x16x8xf32>
    %110 = vector.shape_cast %109 : vector<1x6x16x8xf32> to vector<6x16x8xf32>
    %111 = vector.shape_cast %108 : vector<6x16x8xf32> to vector<1x6x16x8xf32>
    tpu.vector_store %arg5[%c0_87, %c0_88, %c0_89, %c0_90], %111 {strides = array<i32>} : memref<1x8x16x8xf32, #tpu.memory_space<vmem>>, vector<1x6x16x8xf32>,
    %112 = vector.shape_cast %107 : vector<32x8xf32> to vector<2x16x8xf32>
    %c0_91 = arith.constant 0 : index
    %c6_92 = arith.constant 6 : index
    %c0_93 = arith.constant 0 : index
    %c0_94 = arith.constant 0 : index
    %113 = vector.load %arg5[%c0_91, %c6_92, %c0_93, %c0_94] : memref<1x8x16x8xf32, #tpu.memory_space<vmem>>, vector<1x2x16x8xf32>
    %114 = vector.shape_cast %113 : vector<1x2x16x8xf32> to vector<2x16x8xf32>
    %115 = vector.shape_cast %112 : vector<2x16x8xf32> to vector<1x2x16x8xf32>
    tpu.vector_store %arg5[%c0_91, %c6_92, %c0_93, %c0_94], %115 {strides = array<i32>} : memref<1x8x16x8xf32, #tpu.memory_space<vmem>>, vector<1x2x16x8xf32>,
    return
  }
  func.func @transform_0(%arg0: i32, %arg1: i32) -> (i32, i32, i32, i32) {
    %c0_i32 = arith.constant 0 : i32
    %c0_i32_0 = arith.constant 0 : i32
    %c0_i32_1 = arith.constant 0 : i32
    return %arg0, %arg1, %c0_i32, %c0_i32_0 : i32, i32, i32, i32
  }
  func.func @transform_1(%arg0: i32, %arg1: i32) -> (i32, i32, i32, i32) {
    %c1_i32 = arith.constant 1 : i32
    %0 = arith.addi %arg1, %c1_i32 : i32
    %c4_i32 = arith.constant 4 : i32
    %1 = arith.muli %0, %c4_i32 : i32
    %c0_i32 = arith.constant 0 : i32
    %c0_i32_0 = arith.constant 0 : i32
    %c0_i32_1 = arith.constant 0 : i32
    return %arg0, %1, %c0_i32, %c0_i32_0 : i32, i32, i32, i32
  }
  func.func @transform_2(%arg0: i32, %arg1: i32) -> (i32, i32) {
    %c0_i32 = arith.constant 0 : i32
    %c0_i32_0 = arith.constant 0 : i32
    %c0_i32_1 = arith.constant 0 : i32
    return %c0_i32, %c0_i32_0 : i32, i32
  }
  func.func @transform_3(%arg0: i32, %arg1: i32) -> (i32, i32, i32, i32) {
    %c0_i32 = arith.constant 0 : i32
    %c0_i32_0 = arith.constant 0 : i32
    %c0_i32_1 = arith.constant 0 : i32
    return %arg0, %arg1, %c0_i32, %c0_i32_0 : i32, i32, i32, i32
  }
}

</mosaic_0001>

<bundles_post_ra>
// kernel: tpu_custom_call.1
= control target key start
LH: loop header
LB: loop body
LE: loop exit
PB: predicated region body
PF: predicated region fallthrough
CT: control target
= control target key end

     0   :  { %s3921_s12 = smov 0   ;;  %s3923_s13 = smov 0   ;;  %s4503_s0 = inlined_call_operand.vmem [shape: f32[2,18,18,8], index: 0, kind: input, shape index: {}]   ;;  %s4504_s1 = inlined_call_operand.vmem [shape: f32[2,18,18,8], index: 1, kind: input, shape index: {}]   ;;  %s4505_s2 = inlined_call_operand.vmem [shape: f32[72,8], index: 2, kind: input, shape index: {}]   ;;  %s4506_s3 = inlined_call_operand.vmem [shape: f32[2,16,16,8], index: 3, kind: output, shape index: {}]  }
   0x1   :  { %s3925_s14 = smov 0   ;;  %s3927_s15 = smov 0  }
   0x2   :  { %s3929_s16 = smov 0  }
   0x3 LB: > { %s22_s17 = sadd.s32 1, %s3891_s14  ;;  %s25_s18 = sadd.s32 1, %s3895_s15  ;;  %s3899_s16 = sphi %s3929_s16, %s13_s16   ;;  %s3895_s15 = sphi %s3927_s15, %s4510_s15   ;;  %s3891_s14 = sphi %s3925_s14, %s4509_s14   ;;  %s3887_s13 = sphi %s3923_s13, %s4508_s13   ;;  %s3883_s12 = sphi %s3921_s12, %s4507_s12  }
   0x4   : > { %p23_p0 = scmp.ge.s32.totalorder %s22_s17, 2  ;;  %p3029_p1 = scmp.ge.s32.totalorder %s3899_s16, 1 }
   0x5   : > { %p195_p2 = scmp.lt.s32.totalorder %s3899_s16, 5 }
   0x6   : > { %s4512_s17 = smov (%p23_p0, %s22_s17), 0  ;;  %s4514_s18 = smov (!%p23_p0, %s25_s18), %s3895_s15 }
   0x7   : > { %p196_p3 = pnand %p3029_p1, %p195_p2  ;;  %p27_p4 = scmp.ge.s32.totalorder %s4514_s18, 2 }
   0x8   : > { %v3954_v0 = vld [vmem:[%s4505_s2 + $0x18] sm:$0xff] (!%p196_p3)  ;;  %v3959_v1 = vld [vmem:[%s4505_s2 + $0x8] sm:$0xff] (!%p196_p3)  ;;  %s3961_s23 = sshll.u32 (!%p196_p3), %s3883_s12, 3  ;;  %p252_p5 = scmp.lt.s32.totalorder (!%p196_p3), %s3887_s13, 1  ;;  %v3966_v2 = vld [vmem:[%s4505_s2 + $0x20] sm:$0xff] (!%p196_p3)  ;;  %vm319_vm0 = vcmask (!%p196_p3), 64512  }
   0x9   : > { %s4516_s18 = smov (%p27_p4, %s4514_s18), 0  ;;  %199 = sbr.rel (%p196_p3) target bundleno = 386 (0x182), region = 32 }
   0xa   : > { %3498 = vmatprep.subr.mxu0 (!%p196_p3), %v3954_v0  ;;  %3438 = vmatprep.subr.mxu1 (!%p196_p3), %v3959_v1  ;;  %p254_p6 = scmp.lt.s32.totalorder (!%p196_p3), %s3961_s23, 17  ;;  %v3974_v3 = vld [vmem:[%s4505_s2] sm:$0xff] (!%p196_p3)  ;;  %v4006_v10 = vld [vmem:[%s4505_s2 + $0x28] sm:$0xff] (!%p196_p3)  ;;  %v4011_v11 = vld [vmem:[%s4505_s2 + $0x10] sm:$0xff] (!%p196_p3)  ;;  %vm1965_vm1 = vcmask (!%p196_p3), 1046528   ;;  %s3275_s24 = sadd.s32 (!%p196_p3), 8, %s3961_s23 }
   0xb   : > { %3499 = vmatpush3.msra.mxu0 (!%p196_p3), %v3954_v0  ;;  %3439 = vmatpush3.msra.mxu1 (!%p196_p3), %v3959_v1  ;;  %v4116_v32 = vld [vmem:[%s4505_s2 + $0x30] sm:$0xff] (!%p196_p3)  ;;  %v4180_v40 = vld [vmem:[%s4505_s2 + $0x38] sm:$0xff] (!%p196_p3)  ;;  %v4278_v63 = vld [vmem:[%s4505_s2 + $0x40] sm:$0xff] (!%p196_p3)  ;;  %p272_p7 = scmp.lt.s32.totalorder (!%p196_p3), %s3275_s24, 17  ;;  %vm2162_vm2 = vcmask (!%p196_p3), 1045504   ;;  %p285_p8 = scmp.lt.s32.totalorder (!%p196_p3), %s3961_s23, 15 }
   0xc   : > { %3518 = vmatprep.subr.mxu0 (!%p196_p3), %v3966_v2  ;;  %3458 = vmatprep.subr.mxu1 (!%p196_p3), %v3974_v3 }
  0x10   : > { %s4518_s13 = smov (!%p252_p5, %s3887_s13), 1  ;;  %s4520_s24 = smov (!%p272_p7, %s3275_s24), 17 }
  0x11   : > { %s255_s28 = scalar_select %p254_p6, %s3961_s23, 17 }
  0x12   : > { %s3819_s29 = smul.u32 54, %s4518_s13  ;;  %s4522_s23 = smov (!%p285_p8, %s3961_s23), 15 }
  0x13   : > { %s3818_s30 = smul.u32 3, %s255_s28  ;;  %s3036_s6 = sshll.u32 %s4522_s23, 1 }
  0x14   : > { %s3820_s27 = smul.u32 3, %s4520_s24  ;;  %s3037_s7 = sshll.u32 %s4518_s13, 5 }
  0x15   : > { %s258_s4 = sadd.s32 %s3819_s29, %s3818_s30 }
  0x16   : > { %s3031_s5 = sshll.u32 %s258_s4, 3  ;;  %s276_s28 = sadd.s32 %s3820_s27, %s3819_s29 }
  0x17   : > { %s3989_s8 = scalar_lea.vmem %s4503_s0, %s3031_s5  ;;  %s3034_s30 = sshll.u32 %s276_s28, 3 }
  0x18   : > { %v306_v4 = vld [vmem:[%s3989_s8 + $0x1] sm:$0xff]  ;;  %v3075_v5 = vld [vmem:[%s3989_s8 + $0x18] sm:$0xff]  ;;  %v307_v6 = vld [vmem:[%s3989_s8 + $0x9] sm:$0xff]  ;;  %s4340_s5 = scalar_lea.vmem %s4504_s1, %s3034_s30 }
  0x19   : > { %3440 = vmatprep.mubr.msk.f32.mxu1 %vm319_vm0, %v306_v4  ;;  %3500 = vmatprep.mubr.msk.f32.mxu0 %vm319_vm0, %v3075_v5  ;;  %v3076_v7 = vld [vmem:[%s3989_s8 + $0x20] sm:$0xff]  ;;  %v3999_v9 = vld [vmem:[%s3989_s8 + $0x30] sm:$0xff]  ;;  %v4017_v13 = vld [vmem:[%s3989_s8 + $0x38] sm:$0xff] }
  0x1a   : > { %v308_v8 = vld [vmem:[%s3989_s8 + $0x19] sm:$0xff]  ;;  %3441 = vmatmul.mubr.msk.f32.vlgmr.msra.gmra.mrb[0].mxu1 %vm319_vm0, %v307_v6  ;;  %3501 = vmatmul.mubr.msk.f32.vlgmr.msra.gmra.mrb[0].mxu0 %vm319_vm0, %v3076_v7  ;;  %v309_v12 = vld [vmem:[%s3989_s8 + $0x21] sm:$0xff]  ;;  %v4023_v14 = vld [vmem:[%s3989_s8 + $0x31] sm:$0xff] }
  0x1b   : > { %3519 = vmatpush3.msra.mxu0 %v3966_v2  ;;  %3459 = vmatpush3.msra.mxu1 %v3974_v3  ;;  %v4026_v15 = vld [vmem:[%s3989_s8 + $0x48] sm:$0xff]  ;;  %v4038_v16 = vld [vmem:[%s3989_s8 + $0x39] sm:$0xff]  ;;  %v4041_v17 = vld [vmem:[%s3989_s8 + $0x50] sm:$0xff] }
  0x1c   : > { %3443 = vmatprep.mubr.msk.f32.mxu1 %vm319_vm0, %v308_v8  ;;  %3503 = vmatprep.mubr.msk.f32.mxu0 %vm319_vm0, %v3999_v9  ;;  %v4044_v18 = vld [vmem:[%s3989_s8 + $0x49] sm:$0xff]  ;;  %v4047_v19 = vld [vmem:[%s3989_s8 + $0x60] sm:$0xff]  ;;  %v4058_v20 = vld [vmem:[%s3989_s8 + $0x51] sm:$0xff] }
  0x1d   : > { %3538 = vmatprep.subr.mxu0 %v4006_v10  ;;  %3478 = vmatprep.subr.mxu1 %v4011_v11  ;;  %v4061_v21 = vld [vmem:[%s3989_s8 + $0x68] sm:$0xff]  ;;  %v4067_v23 = vld [vmem:[%s3989_s8 + $0x78] sm:$0xff]  ;;  %v4081_v25 = vld [vmem:[%s3989_s8 + $0x80] sm:$0xff] }
  0x1e   : > { %3444 = vmatmul.mubr.msk.f32.gmra.mrb[2].mxu1 %vm319_vm0, %v309_v12  ;;  %3504 = vmatmul.mubr.msk.f32.gmra.mrb[2].mxu0 %vm319_vm0, %v4017_v13  ;;  %v4064_v22 = vld [vmem:[%s3989_s8 + $0x61] sm:$0xff]  ;;  %v4078_v24 = vld [vmem:[%s3989_s8 + $0x69] sm:$0xff]  ;;  %v4084_v26 = vld [vmem:[%s3989_s8 + $0x79] sm:$0xff] }
  0x1f   : > { %3446 = vmatprep.mubr.msk.f32.mxu1 %vm319_vm0, %v4023_v14  ;;  %3506 = vmatprep.mubr.msk.f32.mxu0 %vm319_vm0, %v4026_v15  ;;  %v4087_v27 = vld [vmem:[%s3989_s8 + $0x90] sm:$0xff]  ;;  %v4098_v28 = vld [vmem:[%s3989_s8 + $0x81] sm:$0xff]  ;;  %v4101_v29 = vld [vmem:[%s3989_s8 + $0x98] sm:$0xff] }
  0x20   : > { %v293_v30 = vld [vmem:[%s3989_s8] sm:$0xff]  ;;  %v294_v31 = vld [vmem:[%s3989_s8 + $0x8] sm:$0xff]  ;;  %v4149_v33 = vld [vmem:[%s3989_s8 + $0x91] sm:$0xff]  ;;  %v1966_v49 = vrot.slane %v4087_v27, 1  ;;  %v1967_v50 = vrot.slane %v4101_v29, 1  ;;  %v2164_v4 = vrot.slane %v4101_v29, 2 }
  0x21   : > { %v4160_v34 = vld [vmem:[%s3989_s8 + $0x99] sm:$0xff]  ;;  %v642_v35 = vld [vmem:[%s3989_s8 + $0x2] sm:$0xff]  ;;  %v643_v37 = vld [vmem:[%s3989_s8 + $0xa] sm:$0xff] }
  0x22   : > { %3447 = vmatmul.mubr.msk.f32.gmra.mrb[4].mxu1 %vm319_vm0, %v4038_v16  ;;  %3507 = vmatmul.mubr.msk.f32.gmra.mrb[4].mxu0 %vm319_vm0, %v4041_v17  ;;  %v3123_v36 = vld [vmem:[%s3989_s8 + $0x1a] sm:$0xff]  ;;  %v3124_v38 = vld [vmem:[%s3989_s8 + $0x22] sm:$0xff]  ;;  %v4173_v39 = vld [vmem:[%s3989_s8 + $0x32] sm:$0xff]  ;;  %v1968_v56 = vsel %vm1965_vm1, %v1966_v49, %v1967_v50 }
  0x23   : > { %3449 = vmatprep.mubr.msk.f32.mxu1 %vm319_vm0, %v4044_v18  ;;  %3509 = vmatprep.mubr.msk.f32.mxu0 %vm319_vm0, %v4047_v19  ;;  %v4185_v41 = vld [vmem:[%s3989_s8 + $0x3a] sm:$0xff]  ;;  %v4191_v42 = vld [vmem:[%s3989_s8 + $0x4a] sm:$0xff]  ;;  %v4203_v43 = vld [vmem:[%s3989_s8 + $0x52] sm:$0xff] }
  0x24   : > { %v4206_v44 = vld [vmem:[%s3989_s8 + $0x62] sm:$0xff]  ;;  %v4217_v45 = vld [vmem:[%s3989_s8 + $0x6a] sm:$0xff]  ;;  %v4220_v46 = vld [vmem:[%s3989_s8 + $0x7a] sm:$0xff] }
  0x25   : > { %v4231_v47 = vld [vmem:[%s3989_s8 + $0x82] sm:$0xff]  ;;  %v4234_v48 = vld [vmem:[%s3989_s8 + $0x92] sm:$0xff]  ;;  %v3221_v51 = vld [vmem:[%s3989_s8 + $0xa0] sm:$0x3] }
  0x26   : > { %3450 = vmatmul.mubr.msk.f32.gmra.mrb[6].mxu1 %vm319_vm0, %v4058_v20  ;;  %3510 = vmatmul.mubr.msk.f32.gmra.mrb[6].mxu0 %vm319_vm0, %v4061_v21  ;;  %v4244_v52 = vld [vmem:[%s3989_s8 + $0xa8] sm:$0xff]  ;;  %v4247_v53 = vld [vmem:[%s3989_s8 + $0xb0] sm:$0xff]  ;;  %v4254_v54 = vld [vmem:[%s3989_s8 + $0x9a] sm:$0xff]  ;;  %v1969_v55 = vrot.slane %v3221_v51, 1 }
  0x27   : > { %3452 = vmatprep.mubr.msk.f32.mxu1 %vm319_vm0, %v4064_v22  ;;  %3512 = vmatprep.mubr.msk.f32.mxu0 %vm319_vm0, %v4067_v23  ;;  %v3224_v57 = vld [vmem:[%s3989_s8 + $0xb8] sm:$0x3]  ;;  %v1971_v58 = vrot.slane %v4244_v52, 1  ;;  %v1972_v59 = vrot.slane %v4247_v53, 1 }
  0x28   : > { %v1970_v60 = vsel %vm1965_vm1, %v1967_v50, %v1969_v55  ;;  %v1974_v61 = vrot.slane %v3224_v57, 1 }
  0x29   : > { %v4269_v62 = vsel %vm1965_vm1, %v1971_v58, %v1972_v59 }
  0x2a   : > { %3453 = vmatmul.mubr.msk.f32.gmra.mrb[8].mxu1 %vm319_vm0, %v4078_v24  ;;  %3513 = vmatmul.mubr.msk.f32.gmra.mrb[8].mxu0 %vm319_vm0, %v4081_v25 }
  0x2b   : > { %3455 = vmatprep.mubr.msk.f32.mxu1 %vm319_vm0, %v4084_v26  ;;  %3515 = vmatprep.mubr.msk.f32.mxu0 %vm319_vm0, %v4087_v27 }
  0x2e   : > { %3456 = vmatmul.mubr.msk.f32.gmra.mrb[10].mxu1 %vm319_vm0, %v4098_v28  ;;  %3516 = vmatmul.mubr.msk.f32.gmra.mrb[10].mxu0 %vm319_vm0, %v4101_v29 }
  0x2f   : > { %3460 = vmatprep.mubr.msk.f32.mxu1 %vm319_vm0, %v293_v30  ;;  %3520 = vmatprep.mubr.msk.f32.mxu0 %vm319_vm0, %v308_v8  ;;  %v2169_v8 = vrot.slane %v4247_v53, 2 }
  0x32   : > { %3461 = vmatmul.mubr.msk.f32.vlgmr.msra.gmra.mrb[0].mxu1 %vm319_vm0, %v294_v31  ;;  %3521 = vmatmul.mubr.msk.f32.vlgmr.msra.gmra.mrb[0].mxu0 %vm319_vm0, %v309_v12 }
  0x33   : > { %3539 = vmatpush3.msra.mxu0 %v4006_v10  ;;  %3479 = vmatpush3.msra.mxu1 %v4011_v11 }
  0x34   : > { %3463 = vmatprep.mubr.msk.f32.mxu1 %vm319_vm0, %v3075_v5  ;;  %3523 = vmatprep.mubr.msk.f32.mxu0 %vm319_vm0, %v4023_v14  ;;  %v2166_v5 = vrot.slane %v3221_v51, 2 }
  0x35   : > { %3558 = vmatprep.subr.mxu0 %v4116_v32  ;;  %3618 = vmatprep.subr.mxu1 %v3959_v1 }
  0x36   : > { %3464 = vmatmul.mubr.msk.f32.gmra.mrb[2].mxu1 %vm319_vm0, %v3076_v7  ;;  %3524 = vmatmul.mubr.msk.f32.gmra.mrb[2].mxu0 %vm319_vm0, %v4038_v16  ;;  %v2168_v7 = vrot.slane %v4244_v52, 2 }
  0x37   : > { %3466 = vmatprep.mubr.msk.f32.mxu1 %vm319_vm0, %v3999_v9  ;;  %3526 = vmatprep.mubr.msk.f32.mxu0 %vm319_vm0, %v4044_v18 }
  0x38   : > { %v2170_v12 = vsel %vm2162_vm2, %v2168_v7, %v2169_v8 }
  0x3a   : > { %3467 = vmatmul.mubr.msk.f32.gmra.mrb[4].mxu1 %vm319_vm0, %v4017_v13  ;;  %3527 = vmatmul.mubr.msk.f32.gmra.mrb[4].mxu0 %vm319_vm0, %v4058_v20 }
  0x3b   : > { %3469 = vmatprep.mubr.msk.f32.mxu1 %vm319_vm0, %v4026_v15  ;;  %3529 = vmatprep.mubr.msk.f32.mxu0 %vm319_vm0, %v4064_v22 }
  0x3e   : > { %3470 = vmatmul.mubr.msk.f32.gmra.mrb[6].mxu1 %vm319_vm0, %v4041_v17  ;;  %3530 = vmatmul.mubr.msk.f32.gmra.mrb[6].mxu0 %vm319_vm0, %v4078_v24 }
  0x3f   : > { %3472 = vmatprep.mubr.msk.f32.mxu1 %vm319_vm0, %v4047_v19  ;;  %3532 = vmatprep.mubr.msk.f32.mxu0 %vm319_vm0, %v4084_v26 }
  0x42   : > { %3473 = vmatmul.mubr.msk.f32.gmra.mrb[8].mxu1 %vm319_vm0, %v4061_v21  ;;  %3533 = vmatmul.mubr.msk.f32.gmra.mrb[8].mxu0 %vm319_vm0, %v4098_v28 }
  0x43   : > { %3475 = vmatprep.mubr.msk.f32.mxu1 %vm319_vm0, %v4067_v23  ;;  %3535 = vmatprep.mubr.msk.f32.mxu0 %vm319_vm0, %v4149_v33 }
  0x46   : > { %3476 = vmatmul.mubr.msk.f32.gmra.mrb[10].mxu1 %vm319_vm0, %v4081_v25  ;;  %3536 = vmatmul.mubr.msk.f32.gmra.mrb[10].mxu0 %vm319_vm0, %v4160_v34 }
  0x47   : > { %3480 = vmatprep.mubr.msk.f32.mxu1 %vm319_vm0, %v642_v35  ;;  %3540 = vmatprep.mubr.msk.f32.mxu0 %vm319_vm0, %v3123_v36 }
  0x4a   : > { %3481 = vmatmul.mubr.msk.f32.vlgmr.msra.gmra.mrb[0].mxu1 %vm319_vm0, %v643_v37  ;;  %3541 = vmatmul.mubr.msk.f32.vlgmr.msra.gmra.mrb[0].mxu0 %vm319_vm0, %v3124_v38  ;;  %v3205_v37 = vld [vmem:[%s3989_s8 + $0xaa] sm:$0xff] }
  0x4b   : > { %3559 = vmatpush3.msra.mxu0 %v4116_v32  ;;  %3619 = vmatpush3.msra.mxu1 %v3959_v1  ;;  %v4283_v1 = vsel %vm1965_vm1, %v1972_v59, %v1974_v61 }
  0x4c   : > { %3483 = vmatprep.mubr.msk.f32.mxu1 %vm319_vm0, %v3123_v36  ;;  %3543 = vmatprep.mubr.msk.f32.mxu0 %vm319_vm0, %v4173_v39 }
  0x4d   : > { %3578 = vmatprep.subr.mxu0 %v4180_v40  ;;  %3626 = vmatprep.subr.mxu1 %v3974_v3 }
  0x4e   : > { %3484 = vmatmul.mubr.msk.f32.gmra.mrb[2].mxu1 %vm319_vm0, %v3124_v38  ;;  %3544 = vmatmul.mubr.msk.f32.gmra.mrb[2].mxu0 %vm319_vm0, %v4185_v41 }
  0x4f   : > { %3486 = vmatprep.mubr.msk.f32.mxu1 %vm319_vm0, %v4173_v39  ;;  %3546 = vmatprep.mubr.msk.f32.mxu0 %vm319_vm0, %v4191_v42 }
  0x52   : > { %3487 = vmatmul.mubr.msk.f32.gmra.mrb[4].mxu1 %vm319_vm0, %v4185_v41  ;;  %3547 = vmatmul.mubr.msk.f32.gmra.mrb[4].mxu0 %vm319_vm0, %v4203_v43 }
  0x53   : > { %3489 = vmatprep.mubr.msk.f32.mxu1 %vm319_vm0, %v4191_v42  ;;  %3549 = vmatprep.mubr.msk.f32.mxu0 %vm319_vm0, %v4206_v44 }
  0x56   : > { %3490 = vmatmul.mubr.msk.f32.gmra.mrb[6].mxu1 %vm319_vm0, %v4203_v43  ;;  %3550 = vmatmul.mubr.msk.f32.gmra.mrb[6].mxu0 %vm319_vm0, %v4217_v45 }
  0x57   : > { %3492 = vmatprep.mubr.msk.f32.mxu1 %vm319_vm0, %v4206_v44  ;;  %3552 = vmatprep.mubr.msk.f32.mxu0 %vm319_vm0, %v4220_v46 }
  0x5a   : > { %3493 = vmatmul.mubr.msk.f32.gmra.mrb[8].mxu1 %vm319_vm0, %v4217_v45  ;;  %3553 = vmatmul.mubr.msk.f32.gmra.mrb[8].mxu0 %vm319_vm0, %v4231_v47 }
  0x5b   : > { %3495 = vmatprep.mubr.msk.f32.mxu1 %vm319_vm0, %v4220_v46  ;;  %3555 = vmatprep.mubr.msk.f32.mxu0 %vm319_vm0, %v4234_v48 }
  0x5e   : > { %3496 = vmatmul.mubr.msk.f32.gmra.mrb[10].mxu1 %vm319_vm0, %v4231_v47  ;;  %3556 = vmatmul.mubr.msk.f32.gmra.mrb[10].mxu0 %vm319_vm0, %v4254_v54 }
  0x5f   : > { %3560 = vmatprep.mubr.msk.f32.mxu0 %vm319_vm0, %v3999_v9  ;;  %3620 = vmatprep.mubr.msk.f32.mxu1 %vm319_vm0, %v1968_v56  ;;  %v2167_v9 = vsel %vm2162_vm2, %v2164_v4, %v2166_v5 }
  0x62   : > { %3561 = vmatmul.mubr.msk.f32.vlgmr.msra.gmra.mrb[0].mxu0 %vm319_vm0, %v4017_v13  ;;  %3621 = vmatmul.mubr.msk.f32.vlgmr.msra.gmra.mrb[12].mxu1 %vm319_vm0, %v1970_v60 }
  0x63   : > { %3579 = vmatpush3.msra.mxu0 %v4180_v40  ;;  %3627 = vmatpush3.msra.mxu1 %v3974_v3  ;;  %v2163_v3 = vrot.slane %v4087_v27, 2 }
  0x64   : > { %3563 = vmatprep.mubr.msk.f32.mxu0 %vm319_vm0, %v4026_v15  ;;  %3623 = vmatprep.mubr.msk.f32.mxu1 %vm319_vm0, %v4269_v62  ;;  %v1954_v15 = vld [vmem:[%s4340_s5 + $0x8] sm:$0xff] }
  0x65   : > { %3634 = vmatprep.subr.mxu1 %v4011_v11  ;;  %3598 = vmatprep.subr.mxu0 %v4278_v63  ;;  %v2165_v6 = vsel %vm2162_vm2, %v2163_v3, %v2164_v4 }
  0x66   : > { %3564 = vmatmul.mubr.msk.f32.gmra.mrb[2].mxu0 %vm319_vm0, %v4041_v17  ;;  %3624 = vmatmul.mubr.msk.f32.gmra.mrb[14].mxu1 %vm319_vm0, %v4283_v1 }
  0x67   : > { %3566 = vmatprep.mubr.msk.f32.mxu0 %vm319_vm0, %v4047_v19  ;;  %3628 = vmatprep.mubr.msk.f32.mxu1 %vm319_vm0, %v4087_v27  ;;  %v2367_v19 = vrot.slane %v1954_v15, 1 }
  0x6a   : > { %3567 = vmatmul.mubr.msk.f32.gmra.mrb[4].mxu0 %vm319_vm0, %v4061_v21  ;;  %3629 = vmatmul.mubr.msk.f32.vlgmr.msra.gmra.mrb[12].mxu1 %vm319_vm0, %v4101_v29  ;;  %v2465_v21 = vrot.slane %v1954_v15, 2 }
  0x6b   : > { %3635 = vmatpush3.msra.mxu1 %v4011_v11  ;;  %3569 = vmatprep.mubr.msk.f32.mxu0 %vm319_vm0, %v4067_v23  ;;  %v2171_v11 = vrot.slane %v3224_v57, 2 }
  0x6c   : > { %3631 = vmatprep.mubr.msk.f32.mxu1 %vm319_vm0, %v4244_v52  ;;  %3642 = vmatprep.subr.mxu1 %v3954_v0 }
  0x6d   : > { %v2172_v13 = vsel %vm2162_vm2, %v2169_v8, %v2171_v11 }
  0x6e   : > { %3570 = vmatmul.mubr.msk.f32.gmra.mrb[6].mxu0 %vm319_vm0, %v4081_v25  ;;  %3632 = vmatmul.mubr.msk.f32.gmra.mrb[14].mxu1 %vm319_vm0, %v4247_v53 }
  0x6f   : > { %3572 = vmatprep.mubr.msk.f32.mxu0 %vm319_vm0, %v4087_v27  ;;  %3636 = vmatprep.mubr.msk.f32.mxu1 %vm319_vm0, %v2165_v6  ;;  %v1957_v27 = vld [vmem:[%s4340_s5 + $0x20] sm:$0xff] }
  0x70   : > { %v2659_v30 = vrot.slane %v1957_v27, 1  ;;  %v2757_v35 = vrot.slane %v1957_v27, 2 }
  0x72   : > { %3573 = vmatmul.mubr.msk.f32.gmra.mrb[8].mxu0 %vm319_vm0, %v4101_v29  ;;  %3637 = vmatmul.mubr.msk.f32.vlgmr.msra.gmra.mrb[12].mxu1 %vm319_vm0, %v2167_v9 }
  0x73   : > { %3643 = vmatpush3.msra.mxu1 %v3954_v0  ;;  %3575 = vmatprep.mubr.msk.f32.mxu0 %vm319_vm0, %v4244_v52  ;;  %v1953_v0 = vld [vmem:[%s4340_s5] sm:$0xff] }
  0x74   : > { %3639 = vmatprep.mubr.msk.f32.mxu1 %vm319_vm0, %v2170_v12  ;;  %3650 = vmatprep.subr.mxu1 %v3966_v2  ;;  %v2366_v17 = vrot.slane %v1953_v0, 1 }
  0x76   : > { %3576 = vmatmul.mubr.msk.f32.gmra.mrb[10].mxu0 %vm319_vm0, %v4247_v53  ;;  %3640 = vmatmul.mubr.msk.f32.gmra.mrb[14].mxu1 %vm319_vm0, %v2172_v13 }
  0x77   : > { %3580 = vmatprep.mubr.msk.f32.mxu0 %vm319_vm0, %v4023_v14  ;;  %3644 = vmatprep.mubr.msk.f32.mxu1 %vm319_vm0, %v4244_v52  ;;  %v1955_v14 = vld [vmem:[%s4340_s5 + $0x10] sm:$0x3] }
  0x7a   : > { %3581 = vmatmul.mubr.msk.f32.vlgmr.msra.gmra.mrb[0].mxu0 %vm319_vm0, %v4038_v16  ;;  %3645 = vmatmul.mubr.msk.f32.vlgmr.msra.gmra.mrb[12].mxu1 %vm319_vm0, %v4247_v53  ;;  %v2368_v16 = vsel %vm1965_vm1, %v2366_v17, %v2367_v19 }
  0x7b   : > { %3599 = vmatpush3.msra.mxu0 %v4278_v63  ;;  %3651 = vmatpush3.msra.mxu1 %v3966_v2  ;;  %v2369_v2 = vrot.slane %v1955_v14, 1 }
  0x7c   : > { %3583 = vmatprep.mubr.msk.f32.mxu0 %vm319_vm0, %v4044_v18  ;;  %3647 = vmatprep.mubr.msk.f32.mxu1 %vm319_vm0, %v1953_v0 }
  0x7d   : > { %3658 = vmatprep.subr.mxu1 %v4006_v10  ;;  %v2370_v18 = vsel %vm1965_vm1, %v2367_v19, %v2369_v2 }
  0x7e   : > { %3584 = vmatmul.mubr.msk.f32.gmra.mrb[2].mxu0 %vm319_vm0, %v4058_v20  ;;  %3648 = vmatmul.mubr.msk.f32.gmra.mrb[14].mxu1 %vm319_vm0, %v1954_v15  ;;  %v2464_v20 = vrot.slane %v1953_v0, 2 }
  0x7f   : > { %3586 = vmatprep.mubr.msk.f32.mxu0 %vm319_vm0, %v4064_v22  ;;  %3652 = vmatprep.mubr.msk.f32.mxu1 %vm319_vm0, %v4269_v62  ;;  %v3181_v22 = vld [vmem:[%s3989_s8 + $0xa9] sm:$0xff] }
  0x80   : > { %v2466_v23 = vsel %vm2162_vm2, %v2464_v20, %v2465_v21 }
  0x82   : > { %3587 = vmatmul.mubr.msk.f32.gmra.mrb[4].mxu0 %vm319_vm0, %v4078_v24  ;;  %3653 = vmatmul.mubr.msk.f32.vlgmr.msra.gmra.mrb[12].mxu1 %vm319_vm0, %v4283_v1  ;;  %v3182_v24 = vld [vmem:[%s3989_s8 + $0xb1] sm:$0xff] }
  0x83   : > { %3659 = vmatpush3.msra.mxu1 %v4006_v10  ;;  %3589 = vmatprep.mubr.msk.f32.mxu0 %vm319_vm0, %v4084_v26  ;;  %v2467_v10 = vrot.slane %v1955_v14, 2  ;;  %v1956_v26 = vld [vmem:[%s4340_s5 + $0x18] sm:$0xff] }
  0x84   : > { %3655 = vmatprep.mubr.msk.f32.mxu1 %vm319_vm0, %v2368_v16  ;;  %3666 = vmatprep.subr.mxu1 %v4116_v32  ;;  %v2658_v29 = vrot.slane %v1956_v26, 1 }
  0x85   : > { %v2468_v25 = vsel %vm2162_vm2, %v2465_v21, %v2467_v10 }
  0x86   : > { %3590 = vmatmul.mubr.msk.f32.gmra.mrb[6].mxu0 %vm319_vm0, %v4098_v28  ;;  %3656 = vmatmul.mubr.msk.f32.gmra.mrb[14].mxu1 %vm319_vm0, %v2370_v18  ;;  %v1958_v28 = vld [vmem:[%s4340_s5 + $0x28] sm:$0x3] }
  0x87   : > { %3592 = vmatprep.mubr.msk.f32.mxu0 %vm319_vm0, %v4149_v33  ;;  %3660 = vmatprep.mubr.msk.f32.mxu1 %vm319_vm0, %v2170_v12  ;;  %v2661_v31 = vrot.slane %v1958_v28, 1  ;;  %v2759_v36 = vrot.slane %v1958_v28, 2 }
  0x89   : > { %v2662_v33 = vsel %vm1965_vm1, %v2659_v30, %v2661_v31 }
  0x8a   : > { %3593 = vmatmul.mubr.msk.f32.gmra.mrb[8].mxu0 %vm319_vm0, %v4160_v34  ;;  %3661 = vmatmul.mubr.msk.f32.vlgmr.msra.gmra.mrb[12].mxu1 %vm319_vm0, %v2172_v13  ;;  %v2756_v34 = vrot.slane %v1956_v26, 2 }
  0x8b   : > { %3667 = vmatpush3.msra.mxu1 %v4116_v32  ;;  %3595 = vmatprep.mubr.msk.f32.mxu0 %vm319_vm0, %v3181_v22  ;;  %v2660_v32 = vsel %vm1965_vm1, %v2658_v29, %v2659_v30 }
  0x8c   : > { %3663 = vmatprep.mubr.msk.f32.mxu1 %vm319_vm0, %v2466_v23  ;;  %3674 = vmatprep.subr.mxu1 %v4180_v40  ;;  %v2758_v38 = vsel %vm2162_vm2, %v2756_v34, %v2757_v35 }
  0x8e   : > { %3596 = vmatmul.mubr.msk.f32.gmra.mrb[10].mxu0 %vm319_vm0, %v3182_v24  ;;  %3664 = vmatmul.mubr.msk.f32.gmra.mrb[14].mxu1 %vm319_vm0, %v2468_v25 }
  0x8f   : > { %3600 = vmatprep.mubr.msk.f32.mxu0 %vm319_vm0, %v4173_v39  ;;  %3668 = vmatprep.mubr.msk.f32.mxu1 %vm319_vm0, %v1953_v0  ;;  %v3206_v39 = vld [vmem:[%s3989_s8 + $0xb2] sm:$0xff]  ;;  %s289_s8 = sadd.s32 %s3037_s7, %s3036_s6 }
  0x90   : > { %s3038_s9 = sshll.u32 %s289_s8, 3 }
  0x91   : > { %s4452_s12 = scalar_lea.vmem %s4506_s3, %s3038_s9 }
  0x92   : > { %3601 = vmatmul.mubr.msk.f32.vlgmr.msra.gmra.mrb[0].mxu0 %vm319_vm0, %v4185_v41  ;;  %3669 = vmatmul.mubr.msk.f32.vlgmr.msra.gmra.mrb[12].mxu1 %vm319_vm0, %v1954_v15 }
  0x93   : > { %3675 = vmatpush3.msra.mxu1 %v4180_v40  ;;  %3603 = vmatprep.mubr.msk.f32.mxu0 %vm319_vm0, %v4191_v42  ;;  %v2760_v40 = vsel %vm2162_vm2, %v2757_v35, %v2759_v36 }
  0x94   : > { %3671 = vmatprep.mubr.msk.f32.mxu1 %vm319_vm0, %v1956_v26  ;;  %3682 = vmatprep.subr.mxu1 %v4278_v63 }
  0x96   : > { %3604 = vmatmul.mubr.msk.f32.gmra.mrb[2].mxu0 %vm319_vm0, %v4203_v43  ;;  %3672 = vmatmul.mubr.msk.f32.gmra.mrb[14].mxu1 %vm319_vm0, %v1957_v27 }
  0x97   : > { %3606 = vmatprep.mubr.msk.f32.mxu0 %vm319_vm0, %v4206_v44  ;;  %3676 = vmatprep.mubr.msk.f32.mxu1 %vm319_vm0, %v2368_v16 }
  0x9a   : > { %3607 = vmatmul.mubr.msk.f32.gmra.mrb[4].mxu0 %vm319_vm0, %v4217_v45  ;;  %3677 = vmatmul.mubr.msk.f32.vlgmr.msra.gmra.mrb[12].mxu1 %vm319_vm0, %v2370_v18 }
  0x9b   : > { %3683 = vmatpush3.msra.mxu1 %v4278_v63  ;;  %3609 = vmatprep.mubr.msk.f32.mxu0 %vm319_vm0, %v4220_v46 }
  0x9c   : > { %3679 = vmatprep.mubr.msk.f32.mxu1 %vm319_vm0, %v2660_v32 }
  0x9e   : > { %3610 = vmatmul.mubr.msk.f32.gmra.mrb[6].mxu0 %vm319_vm0, %v4231_v47  ;;  %3680 = vmatmul.mubr.msk.f32.gmra.mrb[14].mxu1 %vm319_vm0, %v2662_v33 }
  0x9f   : > { %3612 = vmatprep.mubr.msk.f32.mxu0 %vm319_vm0, %v4234_v48  ;;  %3684 = vmatprep.mubr.msk.f32.mxu1 %vm319_vm0, %v2466_v23 }
  0xa2   : > { %3613 = vmatmul.mubr.msk.f32.gmra.mrb[8].mxu0 %vm319_vm0, %v4254_v54  ;;  %3685 = vmatmul.mubr.msk.f32.vlgmr.msra.gmra.mrb[12].mxu1 %vm319_vm0, %v2468_v25 }
  0xa3   : > { %3615 = vmatprep.mubr.msk.f32.mxu0 %vm319_vm0, %v3205_v37  ;;  %3687 = vmatprep.mubr.msk.f32.mxu1 %vm319_vm0, %v2758_v38 }
  0xa6   : > { %3616 = vmatmul.mubr.msk.f32.gmra.mrb[10].mxu0 %vm319_vm0, %v3206_v39  ;;  %3688 = vmatmul.mubr.msk.f32.gmra.mrb[14].mxu1 %vm319_vm0, %v2760_v40 }
 0x11d   : > { %v3482_v41 = vpop.f32.mrb[0].mxu1 }
 0x11e   : > { %v757_v42 = vpop.f32.mrb[1].mxu1 }
 0x121   : > { %v3485_v43 = vpop.f32.mrb[2].mxu1 }
 0x122   : > { %v767_v44 = vpop.f32.mrb[3].mxu1 }
 0x125   : > { %v3488_v45 = vpop.f32.mrb[4].mxu1 }
 0x126   : > { %v777_v46 = vpop.f32.mrb[5].mxu1 }
 0x129   : > { %v3491_v47 = vpop.f32.mrb[6].mxu1 }
 0x12a   : > { %v787_v48 = vpop.f32.mrb[7].mxu1 }
 0x12d   : > { %v3494_v49 = vpop.f32.mrb[8].mxu1 }
 0x12e   : > { %v797_v50 = vpop.f32.mrb[9].mxu1 }
 0x131   : > { %v4442_v51 = vpop.f32.mrb[10].mxu1 }
 0x132   : > { %v4444_v52 = vpop.f32.mrb[11].mxu1 }
 0x165   : > { %v3602_v53 = vpop.f32.mrb[0].mxu0 }
 0x166   : > { %v3690_v54 = vadd.f32 %v3602_v53, %v3482_v41  ;;  %v1875_v55 = vpop.f32.mrb[1].mxu0 }
 0x167   : > { %v3691_v56 = vadd.f32 %v1875_v55, %v757_v42 }
 0x168   : > { %v2855_v57 = vmul.f32 0.1, %v3690_v54 }
 0x169   : > { %v2854_v58 = vmul.f32 0.1, %v3691_v56  ;;  %v3605_v59 = vpop.f32.mrb[2].mxu0 }
 0x16a   : > { %v2867_v60 = vmax.f32 %v3690_v54, %v2855_v57  ;;  %v3692_v61 = vadd.f32 %v3605_v59, %v3485_v43  ;;  %v1885_v62 = vpop.f32.mrb[3].mxu0 }
 0x16b   : > { %v2866_v63 = vmax.f32 %v3691_v56, %v2854_v58  ;;  %v3693_v1 = vadd.f32 %v1885_v62, %v767_v44 }
 0x16c   : > { %2887 = vst.msk [vmem:[%s4452_s12 + $0x8] sm:$0xff] %vm319_vm0, %v2867_v60  ;;  %v2857_v3 = vmul.f32 0.1, %v3692_v61 }
 0x16d   : > { %2886 = vst.msk [vmem:[%s4452_s12] sm:$0xff] %vm319_vm0, %v2866_v63  ;;  %v2856_v4 = vmul.f32 0.1, %v3693_v1  ;;  %v3608_v5 = vpop.f32.mrb[4].mxu0 }
 0x16e   : > { %v2869_v6 = vmax.f32 %v3692_v61, %v2857_v3  ;;  %v3694_v7 = vadd.f32 %v3608_v5, %v3488_v45  ;;  %v1895_v8 = vpop.f32.mrb[5].mxu0 }
 0x16f   : > { %v2868_v9 = vmax.f32 %v3693_v1, %v2856_v4  ;;  %v3695_v11 = vadd.f32 %v1895_v8, %v777_v46 }
 0x170   : > { %2889 = vst.msk [vmem:[%s4452_s12 + $0x18] sm:$0xff] %vm319_vm0, %v2869_v6  ;;  %v2859_v12 = vmul.f32 0.1, %v3694_v7 }
 0x171   : > { %2888 = vst.msk [vmem:[%s4452_s12 + $0x10] sm:$0xff] %vm319_vm0, %v2868_v9  ;;  %v2858_v13 = vmul.f32 0.1, %v3695_v11  ;;  %v3611_v0 = vpop.f32.mrb[6].mxu0 }
 0x172   : > { %v2871_v15 = vmax.f32 %v3694_v7, %v2859_v12  ;;  %v3696_v14 = vadd.f32 %v3611_v0, %v3491_v47  ;;  %v1905_v17 = vpop.f32.mrb[7].mxu0 }
 0x173   : > { %v2870_v19 = vmax.f32 %v3695_v11, %v2858_v13  ;;  %v3697_v2 = vadd.f32 %v1905_v17, %v787_v48 }
 0x174   : > { %2891 = vst.msk [vmem:[%s4452_s12 + $0x28] sm:$0xff] %vm319_vm0, %v2871_v15  ;;  %v2861_v16 = vmul.f32 0.1, %v3696_v14 }
 0x175   : > { %2890 = vst.msk [vmem:[%s4452_s12 + $0x20] sm:$0xff] %vm319_vm0, %v2870_v19  ;;  %v2860_v18 = vmul.f32 0.1, %v3697_v2  ;;  %v3614_v20 = vpop.f32.mrb[8].mxu0  ;;  %v3686_v21 = vpop.f32.mrb[12].mxu1 }
 0x176   : > { %v2873_v10 = vmax.f32 %v3696_v14, %v2861_v16  ;;  %v3698_v22 = vadd.f32 %v3614_v20, %v3494_v49  ;;  %v2879_v23 = vmul.f32 0.1, %v3686_v21  ;;  %v1915_v24 = vpop.f32.mrb[9].mxu0  ;;  %v2831_v25 = vpop.f32.mrb[13].mxu1 }
 0x177   : > { %v2872_v26 = vmax.f32 %v3697_v2, %v2860_v18  ;;  %v3699_v27 = vadd.f32 %v1915_v24, %v797_v50  ;;  %v2878_v28 = vmul.f32 0.1, %v2831_v25 }
 0x178   : > { %2893 = vst.msk [vmem:[%s4452_s12 + $0x38] sm:$0xff] %vm319_vm0, %v2873_v10  ;;  %v2863_v29 = vmul.f32 0.1, %v3698_v22  ;;  %v2883_v30 = vmax.f32 %v3686_v21, %v2879_v23 }
 0x179   : > { %2892 = vst.msk [vmem:[%s4452_s12 + $0x30] sm:$0xff] %vm319_vm0, %v2872_v26  ;;  %v2862_v31 = vmul.f32 0.1, %v3699_v27  ;;  %v2882_v32 = vmax.f32 %v2831_v25, %v2878_v28  ;;  %v3617_v33 = vpop.f32.mrb[10].mxu0  ;;  %v3689_v34 = vpop.f32.mrb[14].mxu1 }
 0x17a   : > { %v2875_v35 = vmax.f32 %v3698_v22, %v2863_v29  ;;  %3262 = vst.msk [vmem:[%s4452_s12 + $0x68] sm:$0xff] %vm319_vm0, %v2883_v30  ;;  %v3700_v36 = vadd.f32 %v3617_v33, %v4442_v51  ;;  %v2881_v37 = vmul.f32 0.1, %v3689_v34  ;;  %v1925_v38 = vpop.f32.mrb[11].mxu0  ;;  %v2841_v39 = vpop.f32.mrb[15].mxu1 }
 0x17b   : > { %v2874_v40 = vmax.f32 %v3699_v27, %v2862_v31  ;;  %3261 = vst.msk [vmem:[%s4452_s12 + $0x60] sm:$0xff] %vm319_vm0, %v2882_v32  ;;  %v3701_v41 = vadd.f32 %v1925_v38, %v4444_v52  ;;  %v2880_v42 = vmul.f32 0.1, %v2841_v39 }
 0x17c   : > { %2895 = vst.msk [vmem:[%s4452_s12 + $0x48] sm:$0xff] %vm319_vm0, %v2875_v35  ;;  %v2865_v43 = vmul.f32 0.1, %v3700_v36  ;;  %v2885_v44 = vmax.f32 %v3689_v34, %v2881_v37 }
 0x17d   : > { %2894 = vst.msk [vmem:[%s4452_s12 + $0x40] sm:$0xff] %vm319_vm0, %v2874_v40  ;;  %v2864_v45 = vmul.f32 0.1, %v3701_v41  ;;  %v2884_v46 = vmax.f32 %v2841_v39, %v2880_v42 }
 0x17e   : > { %v2877_v47 = vmax.f32 %v3700_v36, %v2865_v43  ;;  %3264 = vst.msk [vmem:[%s4452_s12 + $0x78] sm:$0xff] %vm319_vm0, %v2885_v44 }
 0x17f   : > { %v2876_v48 = vmax.f32 %v3701_v41, %v2864_v45  ;;  %3263 = vst.msk [vmem:[%s4452_s12 + $0x70] sm:$0xff] %vm319_vm0, %v2884_v46 }
 0x180   : > { %2897 = vst.msk [vmem:[%s4452_s12 + $0x58] sm:$0xff] %vm319_vm0, %v2877_v47 }
 0x181   : > { %2896 = vst.msk [vmem:[%s4452_s12 + $0x50] sm:$0xff] %vm319_vm0, %v2876_v48 }
 0x182 PF: > { %s13_s16 = sadd.s32 1, %s3899_s16   ;;  %s4507_s12 = smov %s3891_s14 }
 0x183   : > { %p10_p9 = scmp.ge.s32.totalorder %s13_s16, 6   ;;  %s4508_s13 = smov %s3895_s15 }
 0x184   : > { %s4509_s14 = smov %s4512_s17  ;;  %s4510_s15 = smov %s4516_s18 }
 0x185   :  { %12 = sbr.rel (!%p10_p9) target bundleno = 3 (0x3), region = 69 }

</bundles_post_ra>
